<compile_context>
chip_gen: v5e
topology: v5e:2x2
jax: 0.10.0
libtpu: 0.0.40
codegen_flags: <defaults>
</compile_context>

<pallas_src>
import math
from functools import partial

import jax
import jax.numpy as jnp
from jax.experimental import pallas as pl
from jax.experimental.pallas import tpu as pltpu


def _fused_attention_kernel(x_ref, w_ref, b_ref, o_ref, *, bt, seq, dp, scale):
    """One grid step = `bt` batch elements.

    x_ref : (bt*seq, dp)  activations (feature dim padded to dp, multiple of 128)
    w_ref : (dp, 3*dp)    fused [Wq | Wk | Wv]
    b_ref : (1, 3*dp)     fused [bq | bk | bv]
    o_ref : (bt*seq, dp)  output slab
    """
    x = x_ref[...]                                                     # (bt*seq, dp)

    # Single fused QKV projection on the MXU; bias folded into the epilogue.
    qkv = jnp.dot(x, w_ref[...], preferred_element_type=jnp.float32) + b_ref[...]

    # Lane-aligned slices (dp is a multiple of 128).
    q = qkv[:, 0 * dp:1 * dp].reshape(bt, seq, dp)
    k = qkv[:, 1 * dp:2 * dp].reshape(bt, seq, dp)
    v = qkv[:, 2 * dp:3 * dp].reshape(bt, seq, dp)

    # Batched q @ k^T without materializing a transposed k tile.
    s = jnp.einsum("bqd,bkd->bqk", q, k,
                   preferred_element_type=jnp.float32) * scale          # (bt, L, L)

    # Numerically-stable softmax over the last axis; reciprocal on the EUP.
    m = jnp.max(s, axis=-1, keepdims=True)
    e = jnp.exp(s - m)
    denom = jnp.sum(e, axis=-1, keepdims=True)
    p = e * pl.reciprocal(denom, approx=True)

    out = jnp.einsum("bqk,bkd->bqd", p, v,
                     preferred_element_type=jnp.float32)                # (bt, L, dp)
    o_ref[...] = out.reshape(bt * seq, dp).astype(o_ref.dtype)


def self_attention_layer(x, wq, bq, wk, bk, wv, bv, *, batch_tile=None):
    """x: (B, L, D) float32.  wq/wk/wv: (D, D) pre-transposed.  b*: (D,)."""
    B, L, D = x.shape
    scale = 1.0 / math.sqrt(float(D))          # PyTorch uses k.shape[-1] ** 0.5 == D

    # Pad the feature dim to a multiple of 128 so every block is lane-dense.
    Dp = 128 * pl.cdiv(D, 128)
    pad = Dp - D

    def pad_w(w):
        return jnp.pad(w, ((0, pad), (0, pad))) if pad else w

    def pad_b(b):
        return jnp.pad(b, (0, pad)) if pad else b

    # Fused [Wq | Wk | Wv] : (Dp, 3*Dp),  fused bias : (1, 3*Dp)
    w_qkv = jnp.concatenate([pad_w(wq), pad_w(wk), pad_w(wv)], axis=1)
    b_qkv = jnp.concatenate([pad_b(bq), pad_b(bk), pad_b(bv)]).reshape(1, 3 * Dp)

    x_p = jnp.pad(x, ((0, 0), (0, 0), (0, pad))) if pad else x           # (B, L, Dp)
    x2d = x_p.reshape(B * L, Dp)                                         # flatten B into M

    # Pick a batch tile that packs the projection M dimension toward ~256 rows
    # while keeping B divisible and the sublane dim (bt*L) a multiple of 8.
    if batch_tile is None:
        target = max(1, 256 // max(L, 1))
        batch_tile = B
        for cand in range(min(B, target), 0, -1):
            if B % cand == 0 and ((cand * L) % 8 == 0 or cand == B):
                batch_tile = cand
                break
    bt = batch_tile
    assert B % bt == 0, "batch_tile must divide batch"
    rows = bt * L
    grid = (B // bt,)

    kernel = partial(_fused_attention_kernel, bt=bt, seq=L, dp=Dp, scale=scale)

    out2d = pl.pallas_call(
        kernel,
        out_shape=jax.ShapeDtypeStruct((B * L, Dp), x.dtype),
        grid_spec=pltpu.PrefetchScalarGridSpec(
            num_scalar_prefetch=0,
            grid=grid,
            in_specs=[
                pl.BlockSpec((rows, Dp), lambda i: (i, 0)),      # activations slab
                pl.BlockSpec((Dp, 3 * Dp), lambda i: (0, 0)),    # fused weights (resident)
                pl.BlockSpec((1, 3 * Dp), lambda i: (0, 0)),     # fused bias (resident)
            ],
            out_specs=pl.BlockSpec((rows, Dp), lambda i: (i, 0)),
        ),
        compiler_params=pltpu.CompilerParams(
            dimension_semantics=("parallel",),
            vmem_limit_bytes=32 * 1024 * 1024,
        ),
    )(x2d, w_qkv, b_qkv)

    out = out2d.reshape(B, L, Dp)
    return out[..., :D] if pad else out


def _reference(x, wq, bq, wk, bk, wv, bv):
    q = x @ wq + bq
    k = x @ wk + bk
    v = x @ wv + bv
    s = jnp.einsum("bld,bmd->blm", q, k) / math.sqrt(x.shape[-1])
    p = jax.nn.softmax(s, axis=-1)
    return jnp.einsum("blm,bmd->bld", p, v)


if __name__ == "__main__":
    # configs.enc_in == D
    B, L, D = 2, 8, 32
    key = jax.random.PRNGKey(0)
    kx, kq, kbq, kk, kbk, kv, kbv = jax.random.split(key, 7)

    x = jax.random.normal(kx, (B, L, D), dtype=jnp.float32)

    # Deterministic nn.Linear-like parameters, stored as (D_in, D_out)
    # (already transposed relative to torch's (out, in) weight layout).
    bound = 1.0 / math.sqrt(D)
    wq = jax.random.uniform(kq, (D, D), jnp.float32, -bound, bound)
    wk = jax.random.uniform(kk, (D, D), jnp.float32, -bound, bound)
    wv = jax.random.uniform(kv, (D, D), jnp.float32, -bound, bound)
    bq = jax.random.uniform(kbq, (D,), jnp.float32, -bound, bound)
    bk = jax.random.uniform(kbk, (D,), jnp.float32, -bound, bound)
    bv = jax.random.uniform(kbv, (D,), jnp.float32, -bound, bound)

    out = self_attention_layer(x, wq, bq, wk, bk, wv, bv)
    out = jax.block_until_ready(out)

    ref = _reference(x, wq, bq, wk, bk, wv, bv)
    assert out.shape == (B, L, D)
    # Tolerance accounts for the EUP approximate-reciprocal softmax normalization.
    err = float(jnp.max(jnp.abs(out - ref)))
    assert err < 2e-3, f"mismatch vs reference: max abs err {err}"

    print("KERNEL_OK")
</pallas_src>

<mosaic_0001>
module attributes {stable_mosaic.version = 11 : i64} {
  func.func @_fused_attention_kernel(%arg0: i32, %arg1: memref<16x128xf32, #tpu.memory_space<vmem>>, %arg2: memref<128x384xf32, #tpu.memory_space<vmem>>, %arg3: memref<1x384xf32, #tpu.memory_space<vmem>>, %arg4: memref<16x128xf32, #tpu.memory_space<vmem>>) attributes {dimension_semantics = [#tpu.dimension_semantics<parallel>], iteration_bounds = array<i64: 1>, scalar_prefetch = 0 : i64, scratch_operands = 0 : i64, tpu.core_type = #tpu.core_type<tc>, window_params = [{transform_indices = @transform_0, window_bounds = array<i64: 16, 128>}, {pipeline_mode = #tpu.pipeline_mode<synchronous>, transform_indices = @transform_1, window_bounds = array<i64: 128, 384>}, {pipeline_mode = #tpu.pipeline_mode<synchronous>, transform_indices = @transform_2, window_bounds = array<i64: 1, 384>}, {transform_indices = @transform_3, window_bounds = array<i64: 16, 128>}]} {
    %c0 = arith.constant 0 : index
    %c0_0 = arith.constant 0 : index
    %0 = vector.load %arg1[%c0, %c0_0] : memref<16x128xf32, #tpu.memory_space<vmem>>, vector<16x128xf32>
    %c0_1 = arith.constant 0 : index
    %c0_2 = arith.constant 0 : index
    %1 = vector.load %arg2[%c0_1, %c0_2] : memref<128x384xf32, #tpu.memory_space<vmem>>, vector<128x384xf32>
    %cst = arith.constant dense<0.000000e+00> : vector<16x384xf32>
    %2 = tpu.matmul %0, %1, %cst {dimension_numbers = #tpu.dot_dimension_numbers<[1], [0], [0], [1], [0, 0, 1, 1], [], []>} : vector<16x128xf32>, vector<128x384xf32>, vector<16x384xf32> -> vector<16x384xf32>
    %c0_3 = arith.constant 0 : index
    %c0_4 = arith.constant 0 : index
    %3 = vector.load %arg3[%c0_3, %c0_4] : memref<1x384xf32, #tpu.memory_space<vmem>>, vector<1x384xf32>
    %4 = vector.broadcast %3 : vector<1x384xf32> to vector<16x384xf32>
    %5 = arith.addf %2, %4 : vector<16x384xf32>
    %6 = vector.extract_strided_slice %5 {offsets = [0, 0], sizes = [16, 128], strides = [1, 1]} : vector<16x384xf32> to vector<16x128xf32>
    %7 = vector.shape_cast %6 : vector<16x128xf32> to vector<2x8x128xf32>
    %8 = vector.extract_strided_slice %5 {offsets = [0, 128], sizes = [16, 128], strides = [1, 1]} : vector<16x384xf32> to vector<16x128xf32>
    %9 = vector.shape_cast %8 : vector<16x128xf32> to vector<2x8x128xf32>
    %10 = vector.extract_strided_slice %5 {offsets = [0, 256], sizes = [16, 128], strides = [1, 1]} : vector<16x384xf32> to vector<16x128xf32>
    %11 = vector.shape_cast %10 : vector<16x128xf32> to vector<2x8x128xf32>
    "tpu.trace_start"() <{level = 10 : i32, message = "bqd,bkd->bqk"}> : () -> ()
    %cst_5 = arith.constant dense<0.000000e+00> : vector<2x8x8xf32>
    %12 = tpu.matmul %7, %9, %cst_5 {dimension_numbers = #tpu.dot_dimension_numbers<[2], [2], [1], [1], [0, 0, 0, 1, 1, 1], [0], [0]>} : vector<2x8x128xf32>, vector<2x8x128xf32>, vector<2x8x8xf32> -> vector<2x8x8xf32>
    "tpu.trace_stop"() : () -> ()
    %cst_6 = arith.constant 0.176776692 : f32
    %13 = vector.broadcast %cst_6 : f32 to vector<2x8x8xf32>
    %14 = arith.mulf %12, %13 : vector<2x8x8xf32>
    %cst_7 = arith.constant dense<0xFF800000> : vector<2x8xf32>
    %15 = vector.multi_reduction <maximumf>, %14, %cst_7 [2] : vector<2x8x8xf32> to vector<2x8xf32>
    %16 = vector.shape_cast %15 : vector<2x8xf32> to vector<2x8x1xf32>
    %17 = vector.broadcast %16 : vector<2x8x1xf32> to vector<2x8x8xf32>
    %18 = arith.subf %14, %17 : vector<2x8x8xf32>
    %19 = math.exp %18 : vector<2x8x8xf32>
    %cst_8 = arith.constant dense<0.000000e+00> : vector<2x8xf32>
    %20 = vector.multi_reduction <add>, %19, %cst_8 [2] : vector<2x8x8xf32> to vector<2x8xf32>
    %21 = vector.shape_cast %20 : vector<2x8xf32> to vector<2x8x1xf32>
    %22 = tpu.reciprocal %21 {approx = true} : vector<2x8x1xf32> -> vector<2x8x1xf32>
    %23 = vector.broadcast %22 : vector<2x8x1xf32> to vector<2x8x8xf32>
    %24 = arith.mulf %19, %23 : vector<2x8x8xf32>
    "tpu.trace_start"() <{level = 10 : i32, message = "bqk,bkd->bqd"}> : () -> ()
    %cst_9 = arith.constant dense<0.000000e+00> : vector<2x8x128xf32>
    %25 = tpu.matmul %24, %11, %cst_9 {dimension_numbers = #tpu.dot_dimension_numbers<[2], [1], [1], [2], [0, 0, 0, 1, 1, 2], [0], [0]>} : vector<2x8x8xf32>, vector<2x8x128xf32>, vector<2x8x128xf32> -> vector<2x8x128xf32>
    "tpu.trace_stop"() : () -> ()
    %26 = vector.shape_cast %25 : vector<2x8x128xf32> to vector<16x128xf32>
    %c0_10 = arith.constant 0 : index
    %c0_11 = arith.constant 0 : index
    %27 = vector.load %arg4[%c0_10, %c0_11] : memref<16x128xf32, #tpu.memory_space<vmem>>, vector<16x128xf32>
    tpu.vector_store %arg4[%c0_10, %c0_11], %26 {strides = array<i32>} : memref<16x128xf32, #tpu.memory_space<vmem>>, vector<16x128xf32>,
    return
  }
  func.func @transform_0(%arg0: i32) -> (i32, i32) {
    %c0_i32 = arith.constant 0 : i32
    %c0_i32_0 = arith.constant 0 : i32
    return %arg0, %c0_i32 : i32, i32
  }
  func.func @transform_1(%arg0: i32) -> (i32, i32) {
    %c0_i32 = arith.constant 0 : i32
    %c0_i32_0 = arith.constant 0 : i32
    %c0_i32_1 = arith.constant 0 : i32
    return %c0_i32, %c0_i32_0 : i32, i32
  }
  func.func @transform_2(%arg0: i32) -> (i32, i32) {
    %c0_i32 = arith.constant 0 : i32
    %c0_i32_0 = arith.constant 0 : i32
    %c0_i32_1 = arith.constant 0 : i32
    return %c0_i32, %c0_i32_0 : i32, i32
  }
  func.func @transform_3(%arg0: i32) -> (i32, i32) {
    %c0_i32 = arith.constant 0 : i32
    %c0_i32_0 = arith.constant 0 : i32
    return %arg0, %c0_i32 : i32, i32
  }
}

</mosaic_0001>

<bundles_post_ra>
// kernel: tpu_custom_call.1
= control target key start
LH: loop header
LB: loop body
LE: loop exit
PB: predicated region body
PF: predicated region fallthrough
CT: control target
= control target key end

     0   :  { %8 = vsyncpa [#allocation3], 0  ;;  %s502_s0 = inlined_call_operand.hbm [shape: f32[16,128], index: 0, kind: input, shape index: {}]   ;;  %s503_s1 = inlined_call_operand.hbm [shape: f32[128,384], index: 1, kind: input, shape index: {}]   ;;  %s504_s2 = inlined_call_operand.hbm [shape: f32[1,384], index: 2, kind: input, shape index: {}]   ;;  %s505_s3 = inlined_call_operand.hbm [shape: f32[16,128], index: 3, kind: output, shape index: {}]  }
   0x1   :  { %9 = vsyncpa [#allocation6], 0  ;;  %s28_s14 = sshll.u32 %s503_s1, 4  ;;  %s29_s14 = int_to_ptr.hbm [resolvable:$true] %s28_s14 }
   0x2   :  { %10 = vsyncpa [#allocation4], 0  ;;  %s440_s15 = smov [#allocation5]   ;;  %s15_s19 = sshll.u32 %s502_s0, 4  ;;  %s16_s19 = int_to_ptr.hbm [resolvable:$true] %s15_s19 }
   0x3   :  { %s30_s16 = sshll.u32 %s440_s15, 4  ;;  %s441_s20 = smov 384   ;;  %s31_s16 = int_to_ptr.vmem [resolvable:$true] %s30_s16 }
   0x4   :  { %s442_s21 = smov 24   ;;  %s443_s22 = smov [#allocation2]  }
   0x5   :  { %36 = dma.hbm_to_vmem [thread:$0]  %s29_s14, 6144, %s31_s16, [#allocation6], %s441_s20, %s441_s20, %s442_s21  }
   0x6   :  { %s17_s23 = sshll.u32 %s443_s22, 4  ;;  %s444_s24 = smov 128   ;;  %s18_s23 = int_to_ptr.vmem [resolvable:$true] %s17_s23 }
   0x7   :  { %s445_s25 = smov 8   ;;  %s42_s27 = sshll.u32 %s504_s2, 4  ;;  %s43_s27 = int_to_ptr.hbm [resolvable:$true] %s42_s27 }
   0x8   :  { %23 = dma.hbm_to_vmem [thread:$0]  %s16_s19, 256, %s18_s23, [#allocation3], %s444_s24, %s444_s24, %s445_s25  }
   0x9   :  { %s446_s28 = smov [#allocation7]  }
   0xa   :  { %s44_s0 = sshll.u32 %s446_s28, 4  ;;  %s45_s0 = int_to_ptr.vmem [resolvable:$true] %s44_s0 }
   0xb   :  { %47 = dma.hbm_to_vmem [thread:$0]  %s43_s27, 48, %s45_s0, [#allocation6]  }
   0xc   :  { %434 = dma.done.wait [#allocation3], 256  }
   0xd   :  { %435 = vsyncadd [#allocation3], 4294967040 }
   0xe   :  { %436 = dma.done.wait [#allocation6], 6192  }
   0xf   :  { %437 = vsyncadd [#allocation6], 4294961104  ;;  %v108_v0 = vld [vmem:[#allocation5 + $0x170] sm:$0xff]  ;;  %v105_v1 = vld [vmem:[#allocation5 + $0x158] sm:$0xff]  ;;  %vm229_vm0 = vcmask 64512   ;;  %s447_s2 = smov [#allocation8]  }
  0x10   :  { %v107_v2 = vld [vmem:[#allocation5 + $0x168] sm:$0xff]  ;;  %141 = vmatpush.msra.mxu1 %v108_v0  ;;  %v104_v3 = vld [vmem:[#allocation5 + $0x150] sm:$0xff]  ;;  %v102_v4 = vld [vmem:[#allocation5 + $0x140] sm:$0xff]  ;;  %s304_s29 = sshll.u32 %s447_s2, 4  ;;  %s306_s5 = sshll.u32 %s505_s3, 4  ;;  %s305_s29 = int_to_ptr.vmem [resolvable:$true] %s304_s29  ;;  %s307_s5 = int_to_ptr.hbm [resolvable:$true] %s306_s5 }
  0x11   :  { %118 = vmatpush.msra.mxu0 %v107_v2  ;;  %v101_v5 = vld [vmem:[#allocation5 + $0x138] sm:$0xff]  ;;  %v99_v6 = vld [vmem:[#allocation5 + $0x128] sm:$0xff]  ;;  %v98_v7 = vld [vmem:[#allocation5 + $0x120] sm:$0xff] }
  0x12   :  { %142 = vmatpush.msra.mxu1 %v105_v1  ;;  %v96_v8 = vld [vmem:[#allocation5 + $0x110] sm:$0xff]  ;;  %v95_v9 = vld [vmem:[#allocation5 + $0x108] sm:$0xff]  ;;  %v93_v10 = vld [vmem:[#allocation5 + $0xf8] sm:$0xff] }
  0x13   :  { %119 = vmatpush.msra.mxu0 %v104_v3  ;;  %v92_v11 = vld [vmem:[#allocation5 + $0xf0] sm:$0xff]  ;;  %v90_v12 = vld [vmem:[#allocation5 + $0xe0] sm:$0xff]  ;;  %v89_v13 = vld [vmem:[#allocation5 + $0xd8] sm:$0xff] }
  0x14   :  { %143 = vmatpush.msra.mxu1 %v102_v4  ;;  %v87_v14 = vld [vmem:[#allocation5 + $0xc8] sm:$0xff]  ;;  %v86_v15 = vld [vmem:[#allocation5 + $0xc0] sm:$0xff]  ;;  %v84_v16 = vld [vmem:[#allocation5 + $0xb0] sm:$0xff] }
  0x15   :  { %120 = vmatpush.msra.mxu0 %v101_v5  ;;  %v83_v17 = vld [vmem:[#allocation5 + $0xa8] sm:$0xff]  ;;  %v81_v18 = vld [vmem:[#allocation5 + $0x98] sm:$0xff]  ;;  %v80_v19 = vld [vmem:[#allocation5 + $0x90] sm:$0xff] }
  0x16   :  { %144 = vmatpush.msra.mxu1 %v99_v6  ;;  %v78_v20 = vld [vmem:[#allocation5 + $0x80] sm:$0xff]  ;;  %v77_v21 = vld [vmem:[#allocation5 + $0x78] sm:$0xff]  ;;  %v75_v22 = vld [vmem:[#allocation5 + $0x68] sm:$0xff] }
  0x17   :  { %121 = vmatpush.msra.mxu0 %v98_v7  ;;  %v74_v23 = vld [vmem:[#allocation5 + $0x60] sm:$0xff]  ;;  %v72_v24 = vld [vmem:[#allocation5 + $0x50] sm:$0xff]  ;;  %v71_v25 = vld [vmem:[#allocation5 + $0x48] sm:$0xff] }
  0x18   :  { %145 = vmatpush.msra.mxu1 %v96_v8  ;;  %v69_v26 = vld [vmem:[#allocation5 + $0x38] sm:$0xff]  ;;  %v68_v27 = vld [vmem:[#allocation5 + $0x30] sm:$0xff]  ;;  %v66_v28 = vld [vmem:[#allocation5 + $0x20] sm:$0xff] }
  0x19   :  { %122 = vmatpush.msra.mxu0 %v95_v9  ;;  %v65_v29 = vld [vmem:[#allocation5 + $0x18] sm:$0xff]  ;;  %v63_v30 = vld [vmem:[#allocation5 + $0x8] sm:$0xff]  ;;  %v62_v31 = vld [vmem:[#allocation5] sm:$0xff] }
  0x1a   :  { %146 = vmatpush.msra.mxu1 %v93_v10  ;;  %v480_v32 = vld [vmem:[#allocation2] sm:$0xff]  ;;  %v61_v33 = vld [vmem:[#allocation2 + $0x8] sm:$0xff]  ;;  %v484_v34 = vld [vmem:[#allocation7] sm:$0x7] }
  0x1b   :  { %123 = vmatpush.msra.mxu0 %v92_v11  ;;  %v113_v35 = vperm.slane %v484_v34, 1  ;;  %v112_v36 = vperm.slane %v484_v34, 0  ;;  %v109_v45 = vld [vmem:[#allocation5 + $0x178] sm:$0xff]  ;;  %v106_v46 = vld [vmem:[#allocation5 + $0x160] sm:$0xff]  ;;  %v103_v47 = vld [vmem:[#allocation5 + $0x148] sm:$0xff] }
  0x1c   :  { %147 = vmatpush.msra.mxu1 %v90_v12  ;;  %164 = vmatpush.msra.mxu2 %v109_v45  ;;  %v100_v48 = vld [vmem:[#allocation5 + $0x130] sm:$0xff]  ;;  %v97_v49 = vld [vmem:[#allocation5 + $0x118] sm:$0xff]  ;;  %v94_v50 = vld [vmem:[#allocation5 + $0x100] sm:$0xff] }
  0x1d   :  { %124 = vmatpush.msra.mxu0 %v89_v13  ;;  %v91_v51 = vld [vmem:[#allocation5 + $0xe8] sm:$0xff]  ;;  %v88_v52 = vld [vmem:[#allocation5 + $0xd0] sm:$0xff]  ;;  %v85_v53 = vld [vmem:[#allocation5 + $0xb8] sm:$0xff]  ;;  %v114_v13 = vperm.slane %v484_v34, 2 }
  0x1e   :  { %148 = vmatpush.msra.mxu1 %v87_v14  ;;  %165 = vmatpush.msra.mxu2 %v106_v46  ;;  %v82_v54 = vld [vmem:[#allocation5 + $0xa0] sm:$0xff]  ;;  %v79_v55 = vld [vmem:[#allocation5 + $0x88] sm:$0xff]  ;;  %v76_v57 = vld [vmem:[#allocation5 + $0x70] sm:$0xff] }
  0x1f   :  { %125 = vmatpush.msra.mxu0 %v86_v15  ;;  %v73_v59 = vld [vmem:[#allocation5 + $0x58] sm:$0xff]  ;;  %v70_v61 = vld [vmem:[#allocation5 + $0x40] sm:$0xff]  ;;  %v67_v62 = vld [vmem:[#allocation5 + $0x28] sm:$0xff] }
  0x20   :  { %149 = vmatpush.msra.mxu1 %v84_v16  ;;  %166 = vmatpush.msra.mxu2 %v103_v47  ;;  %v64_v0 = vld [vmem:[#allocation5 + $0x10] sm:$0xff] }
  0x21   :  { %126 = vmatpush.msra.mxu0 %v83_v17 }
  0x22   :  { %150 = vmatpush.msra.mxu1 %v81_v18  ;;  %167 = vmatpush.msra.mxu2 %v100_v48 }
  0x23   :  { %127 = vmatpush.msra.mxu0 %v80_v19 }
  0x24   :  { %151 = vmatpush.msra.mxu1 %v78_v20  ;;  %168 = vmatpush.msra.mxu2 %v97_v49 }
  0x25   :  { %128 = vmatpush.msra.mxu0 %v77_v21 }
  0x26   :  { %152 = vmatpush.msra.mxu1 %v75_v22  ;;  %169 = vmatpush.msra.mxu2 %v94_v50 }
  0x27   :  { %129 = vmatpush.msra.mxu0 %v74_v23 }
  0x28   :  { %153 = vmatpush.msra.mxu1 %v72_v24  ;;  %170 = vmatpush.msra.mxu2 %v91_v51 }
  0x29   :  { %130 = vmatpush.msra.mxu0 %v71_v25 }
  0x2a   :  { %154 = vmatpush.msra.mxu1 %v69_v26  ;;  %171 = vmatpush.msra.mxu2 %v88_v52 }
  0x2b   :  { %131 = vmatpush.msra.mxu0 %v68_v27 }
  0x2c   :  { %155 = vmatpush.msra.mxu1 %v66_v28  ;;  %172 = vmatpush.msra.mxu2 %v85_v53 }
  0x2d   :  { %132 = vmatpush.msra.mxu0 %v65_v29 }
  0x2e   :  { %156 = vmatpush.msra.mxu1 %v63_v30  ;;  %173 = vmatpush.msra.mxu2 %v82_v54 }
  0x2f   :  { %133 = vmatpush.msra.mxu0 %v62_v31  ;;  %157 = vmatmul.f32.vlgmr.msra.gmra.mxu1 %v480_v32 }
  0x30   :  { %134 = vmatmul.f32.vlgmr.msra.gmra.mxu0 %v480_v32  ;;  %174 = vmatpush.msra.mxu2 %v79_v55 }
  0x32   :  { %175 = vmatpush.msra.mxu2 %v76_v57 }
  0x34   :  { %176 = vmatpush.msra.mxu2 %v73_v59 }
  0x36   :  { %177 = vmatpush.msra.mxu2 %v70_v61 }
  0x37   :  { %160 = vmatmul.f32.gmra.mxu1 %v61_v33 }
  0x38   :  { %137 = vmatmul.f32.gmra.mxu0 %v61_v33  ;;  %178 = vmatpush.msra.mxu2 %v67_v62 }
  0x3a   :  { %179 = vmatpush.msra.mxu2 %v64_v0 }
  0x3b   :  { %180 = vmatmul.f32.vlgmr.msra.gmra.mxu2 %v480_v32 }
  0x43   :  { %183 = vmatmul.f32.gmra.mxu2 %v61_v33 }
  0xac   :  { %v158_v37 = vpop.f32.mrf.mxu1 }
  0xad   :  { %v135_v38 = vpop.f32.mrf.mxu0  ;;  %v159_v39 = vadd.f32 %v158_v37, %v113_v35 }
  0xae   :  { %v136_v40 = vadd.f32 %v135_v38, %v112_v36 }
  0xaf   :  { %202 = vmatpush.xpose.msra.mxu3 %v159_v39 }
  0xb2   :  { %203 = vmatmul.f32.vlgmr.msra.gmra.mxu3 %v136_v40 }
  0xb4   :  { %v161_v41 = vpop.f32.mrf.mxu1 }
  0xb5   :  { %v138_v42 = vpop.f32.mrf.mxu0  ;;  %v162_v43 = vadd.f32 %v161_v41, %v113_v35 }
  0xb6   :  { %v139_v44 = vadd.f32 %v138_v42, %v112_v36 }
  0xb7   :  { %222 = vmatpush.xpose.msrb.mxu3 %v162_v43 }
  0xba   :  { %223 = vmatmul.f32.vlgmr.msrb.gmra.mxu3 %v139_v44 }
  0xbe   :  { %v181_v14 = vpop.f32.mrf.mxu2 }
  0xbf   :  { %v182_v15 = vadd.f32 %v181_v14, %v114_v13 }
  0xc1   :  { %270 = vmatpush.msra.mxu3 %v182_v15 }
  0xc6   :  { %v184_v16 = vpop.f32.mrf.mxu2 }
  0xc7   :  { %v185_v17 = vadd.f32 %v184_v16, %v114_v13 }
  0xc9   :  { %293 = vmatpush.msrb.mxu3 %v185_v17 }
 0x135   :  { %v204_v56 = vpop.f32.mrf.mxu3 }
 0x136   :  { %v227_v58 = vmul.f32 0.17677669, %v204_v56 }
 0x138   :  { %v230_v60 = vsel %vm229_vm0, %v227_v58, -inf }
 0x139   :  { %231 = vmax.xlane.f32.xlu0 %v230_v60 }
 0x13d   :  { %v224_v63 = vpop.f32.mrf.mxu3 }
 0x13e   :  { %v228_v1 = vmul.f32 0.17677669, %v224_v63 }
 0x140   :  { %v233_v2 = vsel %vm229_vm0, %v228_v1, -inf }
 0x141   :  { %234 = vmax.xlane.f32.xlu0 %v233_v2 }
 0x1ac   :  { %v232_v3 = vpop.xlane.xlu0 %231 }
 0x1ad   :  { %v236_v4 = vsub.f32 %v227_v58, %v232_v3 }
 0x1af   :  { %v238_v5 = vmul.f32 1.442695, %v236_v4 }
 0x1b1   :  { %330 = vpow2.f32 %v238_v5 }
 0x1b4   :  { %v235_v6 = vpop.xlane.xlu0 %234 }
 0x1b5   :  { %v237_v7 = vsub.f32 %v228_v1, %v235_v6 }
 0x1b7   :  { %v331_v8 = vpop.eup %330  ;;  %v240_v9 = vmul.f32 1.442695, %v237_v7 }
 0x1b8   :  { %v242_v10 = vsel %vm229_vm0, %v331_v8, 0.0 }
 0x1b9   :  { %332 = vpow2.f32 %v240_v9  ;;  %243 = vadd.xlane.f32.xlu1 %v242_v10 }
 0x1bf   :  { %v333_v11 = vpop.eup %332 }
 0x1c0   :  { %v245_v12 = vsel %vm229_vm0, %v333_v11, 0.0 }
 0x1c1   :  { %246 = vadd.xlane.f32.xlu1 %v245_v12 }
 0x22c   :  { %v244_v18 = vpop.xlane.xlu1 %243 }
 0x22d   :  { %334 = vrcp.f32 %v244_v18 }
 0x233   :  { %v335_v19 = vpop.eup %334 }
 0x234   :  { %v250_v20 = vmul.f32 %v335_v19, %v331_v8  ;;  %v247_v21 = vpop.xlane.xlu1 %246 }
 0x235   :  { %336 = vrcp.f32 %v247_v21 }
 0x236   :  { %320 = vmatmul.msk.f32.vlgmr.msra.gmra.mxu3 %vm229_vm0, %v250_v20 }
 0x23b   :  { %v337_v22 = vpop.eup %336 }
 0x23c   :  { %v251_v23 = vmul.f32 %v337_v22, %v333_v11 }
 0x23e   :  { %321 = vmatmul.msk.f32.vlgmr.msrb.gmra.mxu3 %vm229_vm0, %v251_v23 }
 0x2b9   :  { %v272_v24 = vpop.f32.mrf.mxu3 }
 0x2ba   :  { %298 = vst [vmem:[#allocation8] sm:$0xff] %v272_v24 }
 0x2c1   :  { %v295_v25 = vpop.f32.mrf.mxu3 }
 0x2c2   :  { %299 = vst [vmem:[#allocation8 + $0x8] sm:$0xff] %v295_v25 }
 0x2c3   :  { %312 = dma.vmem_to_hbm [thread:$0]  %s305_s29, 256, %s307_s5, [#allocation4], %s444_s24, %s444_s24, %s445_s25  }
 0x2c4   :  { %438 = dma.done.wait [#allocation4], 256  }
 0x2c5   :  { %439 = vsyncadd [#allocation4], 4294967040 }
 0x2c6   :  { %317 = vsyncpa [#allocation3], 1 }
 0x2c7   :  { %318 = vsyncpa [#allocation6], 1 }
 0x2c8   :  { %319 = vsyncpa [#allocation4], 1 }

</bundles_post_ra>
